<compile_context>
chip_gen: v7x
topology: tpu7x:2x2x1
jax: 0.10.0
libtpu: 0.0.40
codegen_flags: <defaults>
</compile_context>

<pallas_src>
import math

import numpy as np
import jax
import jax.numpy as jnp
from jax import lax
from jax.experimental import pallas as pl
from jax.experimental.pallas import tpu as pltpu  # noqa: F401  (TPU backend)


# ------------------------------- parameters -------------------------------

def init_params(key, D, E, F):
    """FFN + AdaLN parameters. Linear weights stored (in_dim, out_dim): y = x @ W + b."""
    shapes = {
        "w1": (D, F), "b1": (F,),              # FFN.linear1
        "w2": (F, D), "b2": (D,),              # FFN.linear2        (zero_module in PyTorch)
        "ln_g": (D,), "ln_b": (D,),            # AdaLN.norm
        "out_w": (D, D), "out_b": (D,),        # AdaLN.out_layers   (zero_module in PyTorch)
        "emb_w": (E, 2 * D), "emb_b": (2 * D,),  # AdaLN.emb_layers Linear(E, 2D)
    }
    params = {}
    for name, shape in shapes.items():
        if name == "ln_g":
            params[name] = jnp.ones(shape, jnp.float32)
        elif name == "ln_b":
            params[name] = jnp.zeros(shape, jnp.float32)
        else:
            key, sub = jax.random.split(key)
            scale = 0.2 if name.endswith("w") else 0.05
            params[name] = (scale * jax.random.normal(sub, shape)).astype(jnp.float32)
    return params


def prepare_params(params):
    """One-time prep of parameters into kernel-ready natural-shape arrays.

    Runs ONCE at init (outside the jitted forward), so no packing / dynamic-update-slice HLOs
    or fresh HBM allocations remain in the per-step path.
    """
    D = params["w1"].shape[0]
    return {
        "w1": params["w1"],                        # (D, F)
        "b1": params["b1"].reshape(1, -1),         # (1, F)
        "w2": params["w2"],                        # (F, D)
        "b2": params["b2"].reshape(1, -1),         # (1, D)
        "ln_g": params["ln_g"].reshape(1, -1),     # (1, D)
        "ln_b": params["ln_b"].reshape(1, -1),     # (1, D)
        "out_w": params["out_w"],                  # (D, D)
        "out_b": params["out_b"].reshape(1, -1),   # (1, D)
        # AdaLN emb Linear split into scale/shift halves at prep time
        # (PyTorch chunk order: scale = first D columns, shift = last D columns).
        "emb_w_scale": params["emb_w"][:, :D],               # (E, D)
        "emb_b_scale": params["emb_b"][:D].reshape(1, -1),   # (1, D)
        "emb_w_shift": params["emb_w"][:, D:],               # (E, D)
        "emb_b_shift": params["emb_b"][D:].reshape(1, -1),   # (1, D)
    }


# ------------------------------- kernel -------------------------------

def _gelu_tanh(z):
    # tanh-form GELU: the transcendental goes to the EUP slot instead of a VPU polynomial chain.
    c = math.sqrt(2.0 / math.pi)
    return 0.5 * z * (1.0 + jnp.tanh(c * (z + 0.044715 * z * z * z)))


def _ffn_kernel(x_ref, emb_ref, expand_ref,
                w1_ref, b1_ref, w2_ref, b2_ref,
                ln_g_ref, ln_b_ref, out_w_ref, out_b_ref,
                ws_ref, bs_ref, wsh_ref, bsh_ref,
                o_ref):
    # x_ref:      (R, D)   rows = B*T (batch folded into rows)
    # emb_ref:    (B, E)   raw timestep embedding
    # expand_ref: (R, B)   one-hot row -> batch map (constant), broadcasts cond to rows on MXU
    # weights/biases: natural shapes (no slab, no in-kernel lane slices)
    x = x_ref[...]                                   # (R, D)

    # --- AdaLN conditioning, fused in-kernel: SiLU(emb) @ W -> per-batch scale/shift,
    #     then a one-hot matmul expands to per-row (tiny MXU push, no wrapper HLOs). ---
    e = emb_ref[...]                                 # (B, E)
    se = e * jax.nn.sigmoid(e)                       # SiLU
    scale_b = jnp.dot(se, ws_ref[...], preferred_element_type=jnp.float32) + bs_ref[...]
    shift_b = jnp.dot(se, wsh_ref[...], preferred_element_type=jnp.float32) + bsh_ref[...]
    expand = expand_ref[...]                         # (R, B)
    scale = jnp.dot(expand, scale_b, preferred_element_type=jnp.float32)   # (R, D)
    shift = jnp.dot(expand, shift_b, preferred_element_type=jnp.float32)   # (R, D)

    # --- FFN: linear1 -> GELU -> (dropout: eval identity) -> linear2 ---
    h1 = jnp.dot(x, w1_ref[...], preferred_element_type=jnp.float32) + b1_ref[...]
    h1 = _gelu_tanh(h1)
    y = jnp.dot(h1, w2_ref[...], preferred_element_type=jnp.float32) + b2_ref[...]

    # --- AdaLN residual projection: LayerNorm -> FiLM -> SiLU -> (dropout) -> Linear ---
    mu = jnp.mean(y, axis=-1, keepdims=True)
    var = jnp.mean((y - mu) ** 2, axis=-1, keepdims=True)   # biased variance, eps=1e-5 (PyTorch)
    yn = (y - mu) * lax.rsqrt(var + 1e-5) * ln_g_ref[...] + ln_b_ref[...]
    hn = yn * (1.0 + scale) + shift
    hs = hn * jax.nn.sigmoid(hn)                             # SiLU
    proj = jnp.dot(hs, out_w_ref[...], preferred_element_type=jnp.float32) + out_b_ref[...]

    o_ref[...] = (x + proj).astype(o_ref.dtype)


# ------------------------------- wrapper -------------------------------

@jax.jit
def ffn_forward(x, emb, prepped):
    B, T, D = x.shape
    R = B * T

    # One-hot row -> batch expansion matrix; built from static shapes with NumPy at trace time,
    # so it is an embedded constant (no runtime HLOs).
    expand = jnp.asarray(np.repeat(np.eye(B, dtype=np.float32), T, axis=0))   # (R, B)

    # Grid-free pallas_call: the whole problem lives in VMEM in a single pipeline step on
    # v5e/v6e/v7x -> one launch, no per-step overhead; all refs are natural-shape.
    out = pl.pallas_call(
        _ffn_kernel,
        out_shape=jax.ShapeDtypeStruct((R, D), x.dtype),
    )(
        x.reshape(R, D), emb, expand,
        prepped["w1"], prepped["b1"], prepped["w2"], prepped["b2"],
        prepped["ln_g"], prepped["ln_b"], prepped["out_w"], prepped["out_b"],
        prepped["emb_w_scale"], prepped["emb_b_scale"],
        prepped["emb_w_shift"], prepped["emb_b_shift"],
    )
    return out.reshape(B, T, D)


# --------------------------- pure-JAX reference ---------------------------

def reference_forward(x, emb, P):
    D = x.shape[-1]
    se = emb * jax.nn.sigmoid(emb)
    cond = se @ P["emb_w"] + P["emb_b"]                      # (B, 2D)
    scale = cond[:, None, :D]
    shift = cond[:, None, D:]

    h1 = jax.nn.gelu(x @ P["w1"] + P["b1"], approximate=False)   # nn.GELU() exact erf
    y = h1 @ P["w2"] + P["b2"]                               # dropout: eval identity

    mu = jnp.mean(y, axis=-1, keepdims=True)
    var = jnp.mean((y - mu) ** 2, axis=-1, keepdims=True)
    yn = (y - mu) / jnp.sqrt(var + 1e-5) * P["ln_g"] + P["ln_b"]
    hn = yn * (1.0 + scale) + shift
    proj = jax.nn.silu(hn) @ P["out_w"] + P["out_b"]
    return x + proj


# ----------------------------------- main -----------------------------------

if __name__ == "__main__":
    # shapes consistent with the module: latent_dim=32, ffn_dim=64, time_embed_dim=32
    B, T, D = 2, 8, 32
    E, F = 32, 64

    key = jax.random.PRNGKey(0)
    kx, kemb, kp = jax.random.split(key, 3)
    x = jax.random.normal(kx, (B, T, D), jnp.float32)
    emb = jax.random.normal(kemb, (B, E), jnp.float32)
    params = init_params(kp, D, E, F)
    prepped = prepare_params(params)          # one-time, outside the jitted hot path

    out = jax.block_until_ready(ffn_forward(x, emb, prepped))

    ref = reference_forward(x, emb, params)
    err = float(jnp.max(jnp.abs(out - ref)))
    assert out.shape == (B, T, D)
    # tanh-GELU (kernel) vs exact-erf GELU (reference) differ by <~5e-4 pre-projection; f32 math.
    assert err < 1e-2, f"max abs error {err}"
    print("KERNEL_OK")
</pallas_src>

<mosaic_0001>
module attributes {stable_mosaic.version = 11 : i64} {
  func.func @_ffn_kernel(%arg0: memref<16x32xf32, #tpu.memory_space<vmem>>, %arg1: memref<2x32xf32, #tpu.memory_space<vmem>>, %arg2: memref<16x2xf32, #tpu.memory_space<vmem>>, %arg3: memref<32x64xf32, #tpu.memory_space<vmem>>, %arg4: memref<1x64xf32, #tpu.memory_space<vmem>>, %arg5: memref<64x32xf32, #tpu.memory_space<vmem>>, %arg6: memref<1x32xf32, #tpu.memory_space<vmem>>, %arg7: memref<1x32xf32, #tpu.memory_space<vmem>>, %arg8: memref<1x32xf32, #tpu.memory_space<vmem>>, %arg9: memref<32x32xf32, #tpu.memory_space<vmem>>, %arg10: memref<1x32xf32, #tpu.memory_space<vmem>>, %arg11: memref<32x32xf32, #tpu.memory_space<vmem>>, %arg12: memref<1x32xf32, #tpu.memory_space<vmem>>, %arg13: memref<32x32xf32, #tpu.memory_space<vmem>>, %arg14: memref<1x32xf32, #tpu.memory_space<vmem>>, %arg15: memref<16x32xf32, #tpu.memory_space<vmem>>) attributes {dimension_semantics = [], scalar_prefetch = 0 : i64, scratch_operands = 0 : i64, tpu.core_type = #tpu.core_type<tc>} {
    %c0 = arith.constant 0 : index
    %c0_0 = arith.constant 0 : index
    %0 = vector.load %arg0[%c0, %c0_0] : memref<16x32xf32, #tpu.memory_space<vmem>>, vector<16x32xf32>
    %c0_1 = arith.constant 0 : index
    %c0_2 = arith.constant 0 : index
    %1 = vector.load %arg1[%c0_1, %c0_2] : memref<2x32xf32, #tpu.memory_space<vmem>>, vector<2x32xf32>
    %2 = arith.negf %1 : vector<2x32xf32>
    %3 = math.exp %2 : vector<2x32xf32>
    %cst = arith.constant 1.000000e+00 : f32
    %4 = vector.broadcast %cst : f32 to vector<2x32xf32>
    %5 = arith.addf %4, %3 : vector<2x32xf32>
    %6 = arith.divf %4, %5 : vector<2x32xf32>
    %7 = arith.mulf %1, %6 : vector<2x32xf32>
    %c0_3 = arith.constant 0 : index
    %c0_4 = arith.constant 0 : index
    %8 = vector.load %arg11[%c0_3, %c0_4] : memref<32x32xf32, #tpu.memory_space<vmem>>, vector<32x32xf32>
    %cst_5 = arith.constant dense<0.000000e+00> : vector<2x32xf32>
    %9 = tpu.matmul %7, %8, %cst_5 {dimension_numbers = #tpu.dot_dimension_numbers<[1], [0], [0], [1], [0, 0, 1, 1], [], []>} : vector<2x32xf32>, vector<32x32xf32>, vector<2x32xf32> -> vector<2x32xf32>
    %c0_6 = arith.constant 0 : index
    %c0_7 = arith.constant 0 : index
    %10 = vector.load %arg12[%c0_6, %c0_7] : memref<1x32xf32, #tpu.memory_space<vmem>>, vector<1x32xf32>
    %11 = vector.broadcast %10 : vector<1x32xf32> to vector<2x32xf32>
    %12 = arith.addf %9, %11 : vector<2x32xf32>
    %c0_8 = arith.constant 0 : index
    %c0_9 = arith.constant 0 : index
    %13 = vector.load %arg13[%c0_8, %c0_9] : memref<32x32xf32, #tpu.memory_space<vmem>>, vector<32x32xf32>
    %cst_10 = arith.constant dense<0.000000e+00> : vector<2x32xf32>
    %14 = tpu.matmul %7, %13, %cst_10 {dimension_numbers = #tpu.dot_dimension_numbers<[1], [0], [0], [1], [0, 0, 1, 1], [], []>} : vector<2x32xf32>, vector<32x32xf32>, vector<2x32xf32> -> vector<2x32xf32>
    %c0_11 = arith.constant 0 : index
    %c0_12 = arith.constant 0 : index
    %15 = vector.load %arg14[%c0_11, %c0_12] : memref<1x32xf32, #tpu.memory_space<vmem>>, vector<1x32xf32>
    %16 = vector.broadcast %15 : vector<1x32xf32> to vector<2x32xf32>
    %17 = arith.addf %14, %16 : vector<2x32xf32>
    %c0_13 = arith.constant 0 : index
    %c0_14 = arith.constant 0 : index
    %18 = vector.load %arg2[%c0_13, %c0_14] : memref<16x2xf32, #tpu.memory_space<vmem>>, vector<16x2xf32>
    %cst_15 = arith.constant dense<0.000000e+00> : vector<16x32xf32>
    %19 = tpu.matmul %18, %12, %cst_15 {dimension_numbers = #tpu.dot_dimension_numbers<[1], [0], [0], [1], [0, 0, 1, 1], [], []>} : vector<16x2xf32>, vector<2x32xf32>, vector<16x32xf32> -> vector<16x32xf32>
    %cst_16 = arith.constant dense<0.000000e+00> : vector<16x32xf32>
    %20 = tpu.matmul %18, %17, %cst_16 {dimension_numbers = #tpu.dot_dimension_numbers<[1], [0], [0], [1], [0, 0, 1, 1], [], []>} : vector<16x2xf32>, vector<2x32xf32>, vector<16x32xf32> -> vector<16x32xf32>
    %c0_17 = arith.constant 0 : index
    %c0_18 = arith.constant 0 : index
    %21 = vector.load %arg3[%c0_17, %c0_18] : memref<32x64xf32, #tpu.memory_space<vmem>>, vector<32x64xf32>
    %cst_19 = arith.constant dense<0.000000e+00> : vector<16x64xf32>
    %22 = tpu.matmul %0, %21, %cst_19 {dimension_numbers = #tpu.dot_dimension_numbers<[1], [0], [0], [1], [0, 0, 1, 1], [], []>} : vector<16x32xf32>, vector<32x64xf32>, vector<16x64xf32> -> vector<16x64xf32>
    %c0_20 = arith.constant 0 : index
    %c0_21 = arith.constant 0 : index
    %23 = vector.load %arg4[%c0_20, %c0_21] : memref<1x64xf32, #tpu.memory_space<vmem>>, vector<1x64xf32>
    %24 = vector.broadcast %23 : vector<1x64xf32> to vector<16x64xf32>
    %25 = arith.addf %22, %24 : vector<16x64xf32>
    %cst_22 = arith.constant 5.000000e-01 : f32
    %26 = vector.broadcast %cst_22 : f32 to vector<16x64xf32>
    %27 = arith.mulf %26, %25 : vector<16x64xf32>
    %cst_23 = arith.constant 4.471500e-02 : f32
    %28 = vector.broadcast %cst_23 : f32 to vector<16x64xf32>
    %29 = arith.mulf %28, %25 : vector<16x64xf32>
    %30 = arith.mulf %29, %25 : vector<16x64xf32>
    %31 = arith.mulf %30, %25 : vector<16x64xf32>
    %32 = arith.addf %25, %31 : vector<16x64xf32>
    %cst_24 = arith.constant 0.797884583 : f32
    %33 = vector.broadcast %cst_24 : f32 to vector<16x64xf32>
    %34 = arith.mulf %33, %32 : vector<16x64xf32>
    %35 = math.tanh %34 : vector<16x64xf32>
    %cst_25 = arith.constant 1.000000e+00 : f32
    %36 = vector.broadcast %cst_25 : f32 to vector<16x64xf32>
    %37 = arith.addf %36, %35 : vector<16x64xf32>
    %38 = arith.mulf %27, %37 : vector<16x64xf32>
    %c0_26 = arith.constant 0 : index
    %c0_27 = arith.constant 0 : index
    %39 = vector.load %arg5[%c0_26, %c0_27] : memref<64x32xf32, #tpu.memory_space<vmem>>, vector<64x32xf32>
    %cst_28 = arith.constant dense<0.000000e+00> : vector<16x32xf32>
    %40 = tpu.matmul %38, %39, %cst_28 {dimension_numbers = #tpu.dot_dimension_numbers<[1], [0], [0], [1], [0, 0, 1, 1], [], []>} : vector<16x64xf32>, vector<64x32xf32>, vector<16x32xf32> -> vector<16x32xf32>
    %c0_29 = arith.constant 0 : index
    %c0_30 = arith.constant 0 : index
    %41 = vector.load %arg6[%c0_29, %c0_30] : memref<1x32xf32, #tpu.memory_space<vmem>>, vector<1x32xf32>
    %42 = vector.broadcast %41 : vector<1x32xf32> to vector<16x32xf32>
    %43 = arith.addf %40, %42 : vector<16x32xf32>
    %cst_31 = arith.constant dense<0.000000e+00> : vector<16xf32>
    %44 = vector.multi_reduction <add>, %43, %cst_31 [1] : vector<16x32xf32> to vector<16xf32>
    %45 = vector.shape_cast %44 : vector<16xf32> to vector<16x1xf32>
    %cst_32 = arith.constant 3.200000e+01 : f32
    %46 = vector.broadcast %cst_32 : f32 to vector<16x1xf32>
    %47 = arith.divf %45, %46 : vector<16x1xf32>
    %48 = vector.broadcast %47 : vector<16x1xf32> to vector<16x32xf32>
    %49 = arith.subf %43, %48 : vector<16x32xf32>
    %50 = arith.mulf %49, %49 : vector<16x32xf32>
    %cst_33 = arith.constant dense<0.000000e+00> : vector<16xf32>
    %51 = vector.multi_reduction <add>, %50, %cst_33 [1] : vector<16x32xf32> to vector<16xf32>
    %52 = vector.shape_cast %51 : vector<16xf32> to vector<16x1xf32>
    %cst_34 = arith.constant 3.200000e+01 : f32
    %53 = vector.broadcast %cst_34 : f32 to vector<16x1xf32>
    %54 = arith.divf %52, %53 : vector<16x1xf32>
    %55 = vector.broadcast %47 : vector<16x1xf32> to vector<16x32xf32>
    %56 = arith.subf %43, %55 : vector<16x32xf32>
    %cst_35 = arith.constant 9.99999974E-6 : f32
    %57 = vector.broadcast %cst_35 : f32 to vector<16x1xf32>
    %58 = arith.addf %54, %57 : vector<16x1xf32>
    %59 = math.rsqrt %58 : vector<16x1xf32>
    %60 = vector.broadcast %59 : vector<16x1xf32> to vector<16x32xf32>
    %61 = arith.mulf %56, %60 : vector<16x32xf32>
    %c0_36 = arith.constant 0 : index
    %c0_37 = arith.constant 0 : index
    %62 = vector.load %arg7[%c0_36, %c0_37] : memref<1x32xf32, #tpu.memory_space<vmem>>, vector<1x32xf32>
    %63 = vector.broadcast %62 : vector<1x32xf32> to vector<16x32xf32>
    %64 = arith.mulf %61, %63 : vector<16x32xf32>
    %c0_38 = arith.constant 0 : index
    %c0_39 = arith.constant 0 : index
    %65 = vector.load %arg8[%c0_38, %c0_39] : memref<1x32xf32, #tpu.memory_space<vmem>>, vector<1x32xf32>
    %66 = vector.broadcast %65 : vector<1x32xf32> to vector<16x32xf32>
    %67 = arith.addf %64, %66 : vector<16x32xf32>
    %cst_40 = arith.constant 1.000000e+00 : f32
    %68 = vector.broadcast %cst_40 : f32 to vector<16x32xf32>
    %69 = arith.addf %68, %19 : vector<16x32xf32>
    %70 = arith.mulf %67, %69 : vector<16x32xf32>
    %71 = arith.addf %70, %20 : vector<16x32xf32>
    %72 = arith.negf %71 : vector<16x32xf32>
    %73 = math.exp %72 : vector<16x32xf32>
    %cst_41 = arith.constant 1.000000e+00 : f32
    %74 = vector.broadcast %cst_41 : f32 to vector<16x32xf32>
    %75 = arith.addf %74, %73 : vector<16x32xf32>
    %76 = arith.divf %74, %75 : vector<16x32xf32>
    %77 = arith.mulf %71, %76 : vector<16x32xf32>
    %c0_42 = arith.constant 0 : index
    %c0_43 = arith.constant 0 : index
    %78 = vector.load %arg9[%c0_42, %c0_43] : memref<32x32xf32, #tpu.memory_space<vmem>>, vector<32x32xf32>
    %cst_44 = arith.constant dense<0.000000e+00> : vector<16x32xf32>
    %79 = tpu.matmul %77, %78, %cst_44 {dimension_numbers = #tpu.dot_dimension_numbers<[1], [0], [0], [1], [0, 0, 1, 1], [], []>} : vector<16x32xf32>, vector<32x32xf32>, vector<16x32xf32> -> vector<16x32xf32>
    %c0_45 = arith.constant 0 : index
    %c0_46 = arith.constant 0 : index
    %80 = vector.load %arg10[%c0_45, %c0_46] : memref<1x32xf32, #tpu.memory_space<vmem>>, vector<1x32xf32>
    %81 = vector.broadcast %80 : vector<1x32xf32> to vector<16x32xf32>
    %82 = arith.addf %79, %81 : vector<16x32xf32>
    %83 = arith.addf %0, %82 : vector<16x32xf32>
    %c0_47 = arith.constant 0 : index
    %c0_48 = arith.constant 0 : index
    %84 = vector.load %arg15[%c0_47, %c0_48] : memref<16x32xf32, #tpu.memory_space<vmem>>, vector<16x32xf32>
    tpu.vector_store %arg15[%c0_47, %c0_48], %83 {strides = array<i32>} : memref<16x32xf32, #tpu.memory_space<vmem>>, vector<16x32xf32>,
    return
  }
}

</mosaic_0001>

<bundles_post_ra>
// kernel: ffn_forward.1
= control target key start
LH: loop header
LB: loop body
LE: loop exit
PB: predicated region body
PF: predicated region fallthrough
CT: control target
= control target key end

     0   :  { %20 = vsyncpa [#allocation3], 0  ;;  %s1519_s0 = inlined_call_operand.hbm [shape: f32[16,32], index: 0, kind: input, shape index: {}]   ;;  %s1520_s1 = inlined_call_operand.vmem [shape: f32[2,32], index: 1, kind: input, shape index: {}]   ;;  %s1521_s2 = inlined_call_operand.vmem [shape: f32[16,2], index: 2, kind: input, shape index: {}]   ;;  %s1522_s3 = inlined_call_operand.vmem [shape: f32[32,64], index: 3, kind: input, shape index: {}]   ;;  %s1523_s4 = inlined_call_operand.hbm [shape: f32[1,64], index: 4, kind: input, shape index: {}]   ;;  %s1524_s5 = inlined_call_operand.vmem [shape: f32[64,32], index: 5, kind: input, shape index: {}]   ;;  %s1525_s6 = inlined_call_operand.hbm [shape: f32[1,32], index: 6, kind: input, shape index: {}]   ;;  %s1526_s7 = inlined_call_operand.vmem [shape: f32[1,32], index: 7, kind: input, shape index: {}]   ;;  %s1527_s8 = inlined_call_operand.vmem [shape: f32[1,32], index: 8, kind: input, shape index: {}]   ;;  %s1528_s9 = inlined_call_operand.vmem [shape: f32[32,32], index: 9, kind: input, shape index: {}]   ;;  %s1529_s10 = inlined_call_operand.vmem [shape: f32[1,32], index: 10, kind: input, shape index: {}]   ;;  %s1530_s11 = inlined_call_operand.vmem [shape: f32[32,32], index: 11, kind: input, shape index: {}]   ;;  %s1531_s12 = inlined_call_operand.hbm [shape: f32[1,32], index: 12, kind: input, shape index: {}]   ;;  %s1532_s13 = inlined_call_operand.hbm [shape: f32[32,32], index: 13, kind: input, shape index: {}]   ;;  %s1533_s14 = inlined_call_operand.hbm [shape: f32[1,32], index: 14, kind: input, shape index: {}]   ;;  %s1534_s15 = inlined_call_operand.hbm [shape: f32[16,32], index: 15, kind: output, shape index: {}]  }
   0x1   :  { %21 = vsyncpa [#allocation6], 0 }
   0x2   :  { %22 = vsyncpa [#allocation9], 0 }
   0x3   :  { %23 = vsyncpa [#allocation12], 0 }
   0x4   :  { %24 = vsyncpa [#allocation4], 0  ;;  %s1228_s18 = smov [#allocation5]   ;;  %s1229_s20 = smov [#allocation8]  }
   0x5   :  { %s49_s19 = sshll.u32 %s1228_s18, 4  ;;  %s81_s21 = sshll.u32 %s1229_s20, 4  ;;  %s50_s19 = int_to_ptr.vmem [resolvable:$true] %s49_s19  ;;  %s82_s21 = int_to_ptr.vmem [resolvable:$true] %s81_s21 }
   0x6   :  { %s1064_s24 = scalar_lea.hbm %s1523_s4, 16 }
   0x7   :  { %p1065_p0 = scmp.ne.s32.totalorder %s1523_s4, %s1064_s24  ;;  %p1068_p1 = scmp.lt.u32.totalorder %s1064_s24, %s1523_s4 }
   0x9   :  { %p1070_p2 = pnand %p1068_p1, %p1065_p0 }
   0xb   :  { %1073 = shalt.err (!%p1070_p2)
}
   0xc   :  { %s1074_s29 = scalar_lea.vmem %s50_s19, 16  ;;  %s1078_s30 = scalar_lea.vmem %s50_s19, 32 }
   0xd   :  { %p1075_p3 = scmp.ne.s32.totalorder %s50_s19, %s1074_s29  ;;  %p1079_p4 = scmp.lt.s32.totalorder %s50_s19, %s50_s19 }
   0xe   :  { %p1080_p5 = scmp.lt.s32.totalorder %s1078_s30, %s1074_s29 }
  0x10   :  { %p1081_p6 = por %p1080_p5, %p1079_p4 }
  0x12   :  { %p1082_p7 = pnand %p1081_p6, %p1075_p3 }
  0x14   :  { %1085 = shalt.err (!%p1082_p7)
}
  0x15   :  { %52 = dma.hbm_to_vmem [thread:$0]  %s1523_s4, 16, %s50_s19, [#allocation6]  }
  0x16   :  { %s1086_s22 = scalar_lea.hbm %s1531_s12, 16 }
  0x17   :  { %p1087_p8 = scmp.ne.s32.totalorder %s1531_s12, %s1086_s22  ;;  %p1090_p9 = scmp.lt.u32.totalorder %s1086_s22, %s1531_s12 }
  0x19   :  { %p1092_p10 = pnand %p1090_p9, %p1087_p8 }
  0x1b   :  { %1095 = shalt.err (!%p1092_p10)
}
  0x1c   :  { %s1096_s27 = scalar_lea.vmem %s82_s21, 16  ;;  %s1100_s28 = scalar_lea.vmem %s82_s21, 32 }
  0x1d   :  { %p1097_p11 = scmp.ne.s32.totalorder %s82_s21, %s1096_s27  ;;  %p1101_p12 = scmp.lt.s32.totalorder %s82_s21, %s82_s21 }
  0x1e   :  { %p1102_p13 = scmp.lt.s32.totalorder %s1100_s28, %s1096_s27 }
  0x20   :  { %p1103_p0 = por %p1102_p13, %p1101_p12 }
  0x22   :  { %p1104_p1 = pnand %p1103_p0, %p1097_p11 }
  0x24   :  { %1107 = shalt.err (!%p1104_p1)
}
  0x25   :  { %84 = dma.hbm_to_vmem [thread:$0]  %s1531_s12, 16, %s82_s21, [#allocation9]  }
  0x26   :  { %s1230_s29 = smov [#allocation2]   ;;  %s1108_s18 = scalar_lea.hbm %s1519_s0, 256 }
  0x27   :  { %s30_s30 = sshll.u32 %s1230_s29, 4  ;;  %p1109_p2 = scmp.ne.s32.totalorder %s1519_s0, %s1108_s18  ;;  %s31_s30 = int_to_ptr.vmem [resolvable:$true] %s30_s30 }
  0x28   :  { %p1112_p3 = scmp.lt.u32.totalorder %s1108_s18, %s1519_s0 }
  0x2a   :  { %p1114_p4 = pnand %p1112_p3, %p1109_p2 }
  0x2c   :  { %1117 = shalt.err (!%p1114_p4)
}
  0x2d   :  { %s1118_s25 = scalar_lea.vmem %s31_s30, 256  ;;  %p1123_p6 = scmp.lt.s32.totalorder %s31_s30, %s31_s30 }
  0x2e   :  { %p1119_p5 = scmp.ne.s32.totalorder %s31_s30, %s1118_s25  ;;  %p1124_p7 = scmp.lt.s32.totalorder %s1118_s25, %s1118_s25 }
  0x30   :  { %p1125_p8 = por %p1124_p7, %p1123_p6 }
  0x32   :  { %p1126_p9 = pnand %p1125_p8, %p1119_p5 }
  0x34   :  { %1129 = shalt.err (!%p1126_p9)
}
  0x35   :  { %s1231_s12 = smov 128   ;;  %s1232_s21 = smov 8  }
  0x36   :  { %36 = dma.hbm_to_vmem [thread:$0]  %s1519_s0, 256, %s31_s30, [#allocation3], %s1231_s12, %s1231_s12, %s1232_s21  }
  0x37   :  { %s1233_s28 = smov [#allocation7]   ;;  %s1234_s19 = smov [#allocation10]  }
  0x38   :  { %s61_s4 = sshll.u32 %s1233_s28, 4  ;;  %s90_s29 = sshll.u32 %s1234_s19, 4  ;;  %s62_s4 = int_to_ptr.vmem [resolvable:$true] %s61_s4  ;;  %s91_s29 = int_to_ptr.vmem [resolvable:$true] %s90_s29 }
  0x39   :  { %s1130_s18 = scalar_lea.hbm %s1525_s6, 16 }
  0x3a   :  { %p1131_p10 = scmp.ne.s32.totalorder %s1525_s6, %s1130_s18  ;;  %p1134_p11 = scmp.lt.u32.totalorder %s1130_s18, %s1525_s6 }
  0x3c   :  { %p1136_p12 = pnand %p1134_p11, %p1131_p10 }
  0x3e   :  { %1139 = shalt.err (!%p1136_p12)
}
  0x3f   :  { %s1140_s0 = scalar_lea.vmem %s62_s4, 16  ;;  %s1144_s30 = scalar_lea.vmem %s62_s4, 32 }
  0x40   :  { %p1141_p13 = scmp.ne.s32.totalorder %s62_s4, %s1140_s0  ;;  %p1145_p0 = scmp.lt.s32.totalorder %s62_s4, %s62_s4 }
  0x41   :  { %p1146_p1 = scmp.lt.s32.totalorder %s1144_s30, %s1140_s0 }
  0x43   :  { %p1147_p2 = por %p1146_p1, %p1145_p0 }
  0x45   :  { %p1148_p3 = pnand %p1147_p2, %p1141_p13 }
  0x47   :  { %1151 = shalt.err (!%p1148_p3)
}
  0x48   :  { %64 = dma.hbm_to_vmem [thread:$0]  %s1525_s6, 16, %s62_s4, [#allocation6]  }
  0x49   :  { %s1152_s19 = scalar_lea.hbm %s1532_s13, 512 }
  0x4a   :  { %p1153_p4 = scmp.ne.s32.totalorder %s1532_s13, %s1152_s19  ;;  %p1156_p5 = scmp.lt.u32.totalorder %s1152_s19, %s1532_s13 }
  0x4c   :  { %p1158_p6 = pnand %p1156_p5, %p1153_p4 }
  0x4e   :  { %1161 = shalt.err (!%p1158_p6)
}
  0x4f   :  { %s1162_s22 = scalar_lea.vmem %s91_s29, 512  ;;  %p1167_p8 = scmp.lt.s32.totalorder %s91_s29, %s91_s29 }
  0x50   :  { %p1163_p7 = scmp.ne.s32.totalorder %s91_s29, %s1162_s22  ;;  %p1168_p9 = scmp.lt.s32.totalorder %s1162_s22, %s1162_s22 }
  0x52   :  { %p1169_p10 = por %p1168_p9, %p1167_p8 }
  0x54   :  { %p1170_p11 = pnand %p1169_p10, %p1163_p7 }
  0x56   :  { %1173 = shalt.err (!%p1170_p11)
}
  0x57   :  { %96 = dma.hbm_to_vmem [thread:$0]  %s1532_s13, 512, %s91_s29, [#allocation9], %s1231_s12, %s1231_s12, %s1232_s21  }
  0x58   :  { %s1235_s23 = smov [#allocation11]   ;;  %s1174_s25 = scalar_lea.hbm %s1533_s14, 16 }
  0x59   :  { %s103_s24 = sshll.u32 %s1235_s23, 4  ;;  %p1175_p12 = scmp.ne.s32.totalorder %s1533_s14, %s1174_s25  ;;  %s104_s24 = int_to_ptr.vmem [resolvable:$true] %s103_s24 }
  0x5a   :  { %p1178_p13 = scmp.lt.u32.totalorder %s1174_s25, %s1533_s14 }
  0x5c   :  { %p1180_p0 = pnand %p1178_p13, %p1175_p12 }
  0x5e   :  { %1183 = shalt.err (!%p1180_p0)
}
  0x5f   :  { %s1184_s16 = scalar_lea.vmem %s104_s24, 16  ;;  %s1188_s13 = scalar_lea.vmem %s104_s24, 32 }
  0x60   :  { %p1185_p1 = scmp.ne.s32.totalorder %s104_s24, %s1184_s16  ;;  %p1189_p2 = scmp.lt.s32.totalorder %s104_s24, %s104_s24 }
  0x61   :  { %p1190_p3 = scmp.lt.s32.totalorder %s1188_s13, %s1184_s16 }
  0x63   :  { %p1191_p4 = por %p1190_p3, %p1189_p2 }
  0x65   :  { %p1192_p5 = pnand %p1191_p4, %p1185_p1 }
  0x67   :  { %1195 = shalt.err (!%p1192_p5)
}
  0x68   :  { %106 = dma.hbm_to_vmem [thread:$0]  %s1533_s14, 16, %s104_s24, [#allocation12]  }
  0x69   :  { %1218 = dma.done.wait [#allocation3], 256  }
  0x6a   :  { %1219 = vsyncadd [#allocation3], 4294967040 }
  0x6b   :  { %1220 = dma.done.wait [#allocation6], 32  }
  0x6c   :  { %1221 = vsyncadd [#allocation6], 4294967264 }
  0x6d   :  { %1222 = dma.done.wait [#allocation9], 528  }
  0x6e   :  { %1223 = vsyncadd [#allocation9], 4294966768 }
  0x6f   :  { %1224 = dma.done.wait [#allocation12], 16  }
  0x70   :  { %1225 = vsyncadd [#allocation12], 4294967280  ;;  %v1236_v0 = vmov 0.0|0.0   ;;  %vm1237_vm0 = vmmov 0   ;;  %v1238_v1 = vmov 0.0   ;;  %v220_v2 = vld [vmem:[#allocation10] sm:$0xff] }
  0x71   :  { %994 = vmatprep.subr.bf16.mxu1 %v1236_v0  ;;  %934 = vmatprep.mubr.msk.f32.mxu1 %vm1237_vm0, %v1238_v1  ;;  %v221_v3 = vld [vmem:[#allocation10 + $0x8] sm:$0xff]  ;;  %v222_v4 = vld [vmem:[#allocation10 + $0x10] sm:$0xff]  ;;  %v223_v6 = vld [vmem:[#allocation10 + $0x18] sm:$0xff]  ;;  %vm146_vm1 = vcmask 261120   ;;  %vm303_vm2 = vcmask 15360   ;;  %vm310_vm3 = vcmask 1041408  }
  0x72   :  { %988 = vmatprep.subr.bf16.mxu0 %v1236_v0  ;;  %923 = vmatprep.mubr.msk.f32.mxu0 %vm1237_vm0, %v1238_v1  ;;  %v995_v5 = vpack.c.bf16 %v221_v3, %v220_v2  ;;  %v389_v7 = vld [vmem:[%s1522_s3] sm:$0xff]  ;;  %v390_v8 = vld [vmem:[%s1522_s3 + $0x8] sm:$0xff]  ;;  %v998_v10 = vpack.c.bf16 %v223_v6, %v222_v4  ;;  %v137_v15 = vld [vmem:[%s1530_s11 + $0x10] sm:$0xff]  ;;  %vm514_vm4 = vcmask 523264  }
  0x73   :  { %v127_v9 = vld [vmem:[%s1520_s1] sm:$0x3]  ;;  %v1000_v13 = vpack.c.bf16 %v390_v8, %v389_v7  ;;  %v136_v14 = vld [vmem:[%s1530_s11 + $0x8] sm:$0xff]  ;;  %v138_v16 = vld [vmem:[%s1530_s11 + $0x18] sm:$0xff] }
  0x74   :  { %996 = vmatpush3.bf16.msra.mxu1 %v995_v5  ;;  %v853_v11 = vmul.f32 -1.442695, %v127_v9  ;;  %v135_v12 = vld [vmem:[%s1530_s11] sm:$0xff]  ;;  %v992_v18 = vpack.c.bf16 %v138_v16, %v137_v15  ;;  %v391_v21 = vld [vmem:[%s1522_s3 + $0x10] sm:$0xff]  ;;  %v392_v22 = vld [vmem:[%s1522_s3 + $0x18] sm:$0xff] }
  0x75   :  { %997 = vmatprep.subr.bf16.mxu1 %v1236_v0  ;;  %v989_v17 = vpack.c.bf16 %v136_v14, %v135_v12  ;;  %v1004_v25 = vpack.c.bf16 %v392_v22, %v391_v21  ;;  %v1425_v26 = vld [vmem:[#allocation2] sm:$0xff]  ;;  %v1431_v27 = vld [vmem:[#allocation2 + $0x8] sm:$0xff]  ;;  %v856_v29 = vld [vmem:[#allocation11] ss:$0 sm:$0xff] }
  0x76   :  { %1044 = vpow2.f32 %v853_v11  ;;  %v301_v28 = vld [vmem:[%s1521_s2] sm:$0xff]  ;;  %v500_v31 = vld [vmem:[%s1524_s5 + $0x8] sm:$0xff]  ;;  %v854_v32 = vld [vmem:[#allocation8] ss:$0 sm:$0xff] }
  0x77   :  { %990 = vmatpush3.bf16.msra.mxu0 %v989_v17  ;;  %v499_v30 = vld [vmem:[%s1524_s5] sm:$0xff]  ;;  %v501_v34 = vld [vmem:[%s1524_s5 + $0x10] sm:$0xff]  ;;  %v502_v35 = vld [vmem:[%s1524_s5 + $0x18] sm:$0xff] }
  0x78   :  { %999 = vmatpush3.bf16.msra.mxu1 %v998_v10  ;;  %991 = vmatprep.subr.bf16.mxu0 %v1236_v0  ;;  %v1008_v39 = vpack.c.bf16 %v500_v31, %v499_v30  ;;  %v302_v42 = vld [vmem:[%s1521_s2 + $0x8] sm:$0xff]  ;;  %v1012_v43 = vpack.c.bf16 %v502_v35, %v501_v34  ;;  %v503_v44 = vld [vmem:[%s1524_s5 + $0x20] sm:$0xff]  ;;  %v861_v46 = vld [vmem:[#allocation5] ss:$0 sm:$0xff] }
  0x79   :  { %1001 = vmatprep.subr.bf16.mxu1 %v1000_v13  ;;  %v504_v45 = vld [vmem:[%s1524_s5 + $0x28] sm:$0xff]  ;;  %v505_v49 = vld [vmem:[%s1524_s5 + $0x30] sm:$0xff]  ;;  %v506_v50 = vld [vmem:[%s1524_s5 + $0x38] sm:$0xff] }
  0x7a   :  { %v1016_v47 = vpack.c.bf16 %v504_v45, %v503_v44  ;;  %v1020_v55 = vpack.c.bf16 %v506_v50, %v505_v49  ;;  %v864_v11 = vld [vmem:[#allocation7] ss:$0 sm:$0xff]  ;;  %v867_v45 = vld [vmem:[%s1526_s7] ss:$0 sm:$0xff] }
  0x7b   :  { %993 = vmatpush3.bf16.msra.mxu0 %v992_v18  ;;  %v739_v35 = vld [vmem:[%s1528_s9 + $0x10] sm:$0xff] }
  0x80   :  { %v1045_v19 = vpop.eup %1044 }
  0x81   :  { %v131_v20 = vadd.f32 1.0, %v1045_v19 }
  0x83   :  { %1046 = vrcp.f32 %v131_v20 }
  0x8d   :  { %v1047_v23 = vpop.eup %1046 }
  0x8e   :  { %v134_v24 = vmul.f32 %v1047_v23, %v127_v9 }
  0x90   :  { %935 = vmatmul.mubr.msk.f32.vlgmr.msra.gmra.mrb[0].mxu1 %vm146_vm1, %v134_v24  ;;  %924 = vmatmul.mubr.msk.f32.vlgmr.msra.gmra.mrb[0].mxu0 %vm146_vm1, %v134_v24 }
  0x91   :  { %1003 = vmatpush3.bf16.msra.mxu1 %v1000_v13  ;;  %950 = vmatprep.mubr.msk.f32.mxu1 %vm146_vm1, %v1425_v26 }
  0x92   :  { %1005 = vmatprep.subr.bf16.mxu1 %v1004_v25  ;;  %939 = vmatprep.mubr.msk.f32.mxu0 %vm303_vm2, %v301_v28 }
  0x95   :  { %1007 = vmatpush3.bf16.msra.mxu1 %v1004_v25 }
  0x98   :  { %951 = vmatmul.mubr.msk.f32.vlgmr.msra.gmra.mrb[2].mxu1 %vm146_vm1, %v1431_v27 }
  0x99   :  { %974 = vmatprep.mubr.msk.f32.mxu1 %vm303_vm2, %v301_v28 }
 0x163   :  { %v297_v33 = vpop.f32.mrb[0].mxu1  ;;  %v216_v36 = vpop.f32.mrb[0].mxu0 }
 0x164   :  { %v298_v37 = vadd.f32 %v856_v29, %v297_v33  ;;  %v936_v38 = vpop.f32.mrb[1].mxu1  ;;  %v217_v40 = vadd.f32 %v854_v32, %v216_v36  ;;  %v925_v41 = vpop.f32.mrb[1].mxu0  ;;  %v737_v32 = vld [vmem:[%s1528_s9] sm:$0xff]  ;;  %v738_v33 = vld [vmem:[%s1528_s9 + $0x8] sm:$0xff]  ;;  %v740_v36 = vld [vmem:[%s1528_s9 + $0x18] sm:$0xff]  ;;  %s1239_s9 = smov [#allocation13]  }
 0x165   :  { %v1024_v34 = vpack.c.bf16 %v738_v33, %v737_v32  ;;  %s838_s6 = sshll.u32 %s1239_s9, 4  ;;  %s839_s6 = int_to_ptr.vmem [resolvable:$true] %s838_s6 }
 0x166   :  { %937 = vmatprep.subr.msk.mxu0 %vm310_vm3, %v298_v37  ;;  %972 = vmatprep.subr.msk.mxu1 %vm310_vm3, %v217_v40  ;;  %s1196_s4 = scalar_lea.vmem %s839_s6, 256  ;;  %p1201_p7 = scmp.lt.s32.totalorder %s839_s6, %s839_s6 }
 0x167   :  { %938 = vmatpush3.msk.msra.mxu0 %vm310_vm3, %v298_v37  ;;  %973 = vmatpush3.msk.msra.mxu1 %vm310_vm3, %v217_v40  ;;  %v1028_v37 = vpack.c.bf16 %v740_v36, %v739_v35  ;;  %p1197_p6 = scmp.ne.s32.totalorder %s839_s6, %s1196_s4  ;;  %p1202_p8 = scmp.lt.s32.totalorder %s1196_s4, %s1196_s4 }
 0x168   :  { %940 = vmatmul.mubr.msk.f32.vlgmr.msra.gmra.mrb[2].mxu0 %vm303_vm2, %v302_v42  ;;  %1009 = vmatprep.subr.bf16.mxu0 %v1008_v39 }
 0x169   :  { %1011 = vmatpush3.bf16.msra.mxu0 %v1008_v39  ;;  %975 = vmatmul.mubr.msk.f32.vlgmr.msra.gmra.mrb[4].mxu1 %vm303_vm2, %v302_v42  ;;  %p1203_p9 = por %p1202_p8, %p1201_p7 }
 0x16a   :  { %1013 = vmatprep.subr.bf16.mxu0 %v1012_v43  ;;  %1025 = vmatprep.subr.bf16.mxu1 %v1024_v34 }
 0x16b   :  { %v952_v48 = vpop.f32.mrb[2].mxu1  ;;  %1027 = vmatpush3.bf16.msra.mxu1 %v1024_v34  ;;  %p1204_p10 = pnand %p1203_p9, %p1197_p6 }
 0x16c   :  { %v478_v51 = vadd.f32 %v952_v48, %v861_v46  ;;  %v472_v52 = vpop.f32.mrb[3].mxu1  ;;  %1029 = vmatprep.subr.bf16.mxu1 %v1028_v37 }
 0x16d   :  { %v473_v53 = vadd.f32 %v861_v46, %v472_v52  ;;  %1015 = vmatpush3.bf16.msra.mxu0 %v1012_v43 }
 0x16e   :  { %v484_v54 = vmul.f32 0.044715, %v478_v51  ;;  %1017 = vmatprep.subr.bf16.mxu0 %v1016_v47  ;;  %v482_v6 = vmul.f32 0.5, %v478_v51 }
 0x16f   :  { %v483_v56 = vmul.f32 0.044715, %v473_v53  ;;  %v481_v4 = vmul.f32 0.5, %v473_v53  ;;  %1031 = vmatpush3.bf16.msra.mxu1 %v1028_v37 }
 0x170   :  { %v486_v57 = vmul.f32 %v484_v54, %v478_v51 }
 0x171   :  { %v485_v58 = vmul.f32 %v483_v56, %v473_v53  ;;  %1019 = vmatpush3.bf16.msra.mxu0 %v1016_v47  ;;  %v868_v47 = vld [vmem:[%s1527_s8] ss:$0 sm:$0xff] }
 0x172   :  { %v488_v59 = vmul.f32 %v486_v57, %v478_v51  ;;  %1021 = vmatprep.subr.bf16.mxu0 %v1020_v55 }
 0x173   :  { %v487_v60 = vmul.f32 %v485_v58, %v473_v53 }
 0x174   :  { %v490_v61 = vadd.f32 %v488_v59, %v478_v51 }
 0x175   :  { %v489_v62 = vadd.f32 %v487_v60, %v473_v53  ;;  %1023 = vmatpush3.bf16.msra.mxu0 %v1020_v55 }
 0x176   :  { %v492_v63 = vmul.f32 0.7978846, %v490_v61 }
 0x177   :  { %v491_v0 = vmul.f32 0.7978846, %v489_v62 }
 0x178   :  { %1048 = vtanh.f32 %v492_v63 }
 0x179   :  { %1050 = vtanh.f32 %v491_v0 }
 0x182   :  { %v1049_v1 = vpop.eup %1048 }
 0x183   :  { %v1051_v2 = vpop.eup %1050  ;;  %v496_v3 = vadd.f32 1.0, %v1049_v1 }
 0x184   :  { %v495_v5 = vadd.f32 1.0, %v1051_v2 }
 0x185   :  { %v498_v8 = vmul.f32 %v496_v3, %v482_v6  ;;  %v874_v6 = vld [vmem:[%s1529_s10] ss:$0 sm:$0xff] }
 0x186   :  { %v497_v7 = vmul.f32 %v495_v5, %v481_v4 }
 0x188   :  { %969 = vmatprep.mubr.msk.f32.mxu0 %vm514_vm4, %v497_v7 }
 0x189   :  { %970 = vmatmul.mubr.msk.f32.vlgmr.msra.gmra.mrb[4].mxu0 %vm514_vm4, %v498_v8 }
 0x23b   :  { %v941_v9 = vpop.f32.mrb[2].mxu0 }
 0x23c   :  { %v380_v10 = vpop.f32.mrb[3].mxu0  ;;  %v976_v30 = vpop.f32.mrb[4].mxu1 }
 0x23d   :  { %v710_v31 = vpop.f32.mrb[5].mxu1  ;;  %v716_v56 = vadd.f32 1.0, %v976_v30 }
 0x23e   :  { %v711_v49 = vadd.f32 1.0, %v710_v31 }
 0x25c   :  { %v971_v12 = vpop.f32.mrb[4].mxu0 }
 0x25d   :  { %v587_v13 = vpop.f32.mrb[5].mxu0  ;;  %v593_v15 = vadd.f32 %v971_v12, %v864_v11 }
 0x25e   :  { %v588_v14 = vadd.f32 %v864_v11, %v587_v13 }
 0x25f   :  { %v599_v17 = vsel %vm146_vm1, %v593_v15, 0.0 }
 0x260   :  { %v596_v16 = vsel %vm146_vm1, %v588_v14, 0.0 }
 0x261   :  { %597 = vadd.xlane.f32.xlu0 %v596_v16 }
 0x265   :  { %600 = vadd.xlane.f32.xlu0 %v599_v17 }
 0x2ee   :  { %v598_v18 = vpop.xlane.xlu0 %597 }
 0x2ef   :  { %v603_v19 = vmul.f32 0.03125, %v598_v18 }
 0x2f1   :  { %v605_v20 = vsub.f32 %v588_v14, %v603_v19 }
 0x2f2   :  { %v601_v21 = vpop.xlane.xlu0 %600 }
 0x2f3   :  { %v604_v22 = vmul.f32 0.03125, %v601_v21  ;;  %v607_v23 = vmul.f32 %v605_v20, %v605_v20 }
 0x2f5   :  { %v606_v24 = vsub.f32 %v593_v15, %v604_v22  ;;  %v609_v25 = vsel %vm146_vm1, %v607_v23, 0.0 }
 0x2f6   :  { %610 = vadd.xlane.f32.xlu1 %v609_v25 }
 0x2f7   :  { %v608_v28 = vmul.f32 %v606_v24, %v606_v24 }
 0x2f9   :  { %v612_v29 = vsel %vm146_vm1, %v608_v28, 0.0 }
 0x2fa   :  { %613 = vadd.xlane.f32.xlu1 %v612_v29 }
 0x383   :  { %v611_v38 = vpop.xlane.xlu1 %610 }
 0x384   :  { %v615_v39 = vmul.f32 0.03125, %v611_v38 }
 0x386   :  { %v617_v40 = vadd.f32 1e-05, %v615_v39 }
 0x387   :  { %v614_v41 = vpop.xlane.xlu1 %613 }
 0x388   :  { %1052 = vrsqrt.f32 %v617_v40  ;;  %v616_v42 = vmul.f32 0.03125, %v614_v41 }
 0x38a   :  { %v618_v43 = vadd.f32 1e-05, %v616_v42 }
 0x38c   :  { %1054 = vrsqrt.f32 %v618_v43 }
 0x392   :  { %v1053_v44 = vpop.eup %1052 }
 0x393   :  { %v621_v46 = vmul.f32 %v1053_v44, %v605_v20 }
 0x395   :  { %v630_v48 = vmul.f32 %v867_v45, %v621_v46 }
 0x396   :  { %v1055_v50 = vpop.eup %1054 }
 0x397   :  { %v622_v51 = vmul.f32 %v1055_v50, %v606_v24  ;;  %v639_v52 = vadd.f32 %v868_v47, %v630_v48 }
 0x399   :  { %v631_v53 = vmul.f32 %v867_v45, %v622_v51  ;;  %v719_v54 = vmul.f32 %v711_v49, %v639_v52 }
 0x39b   :  { %v640_v55 = vadd.f32 %v868_v47, %v631_v53  ;;  %v721_v57 = vadd.f32 %v719_v54, %v380_v10 }
 0x39d   :  { %v720_v58 = vmul.f32 %v716_v56, %v640_v55  ;;  %v872_v59 = vmul.f32 -1.442695, %v721_v57 }
 0x39f   :  { %v722_v60 = vadd.f32 %v941_v9, %v720_v58  ;;  %1056 = vpow2.f32 %v872_v59 }
 0x3a1   :  { %v873_v61 = vmul.f32 -1.442695, %v722_v60 }
 0x3a3   :  { %1058 = vpow2.f32 %v873_v61 }
 0x3a9   :  { %v1057_v62 = vpop.eup %1056 }
 0x3aa   :  { %v729_v63 = vadd.f32 1.0, %v1057_v62 }
 0x3ac   :  { %1060 = vrcp.f32 %v729_v63 }
 0x3ad   :  { %v1059_v0 = vpop.eup %1058 }
 0x3ae   :  { %v730_v1 = vadd.f32 1.0, %v1059_v0 }
 0x3b0   :  { %1062 = vrcp.f32 %v730_v1 }
 0x3b6   :  { %v1061_v2 = vpop.eup %1060 }
 0x3b7   :  { %v735_v3 = vmul.f32 %v1061_v2, %v721_v57 }
 0x3b9   :  { %985 = vmatprep.mubr.msk.f32.mxu1 %vm146_vm1, %v735_v3 }
 0x3ba   :  { %v1063_v4 = vpop.eup %1062 }
 0x3bb   :  { %v736_v5 = vmul.f32 %v1063_v4, %v722_v60 }
 0x3bd   :  { %986 = vmatmul.mubr.msk.f32.vlgmr.msra.gmra.mrb[6].mxu1 %vm146_vm1, %v736_v5 }
 0x490   :  { %v987_v7 = vpop.f32.mrb[6].mxu1 }
 0x491   :  { %v826_v8 = vadd.f32 %v987_v7, %v874_v6  ;;  %v820_v9 = vpop.f32.mrb[7].mxu1 }
 0x492   :  { %v821_v10 = vadd.f32 %v874_v6, %v820_v9 }
 0x493   :  { %v830_v11 = vadd.f32 %v826_v8, %v1431_v27 }
 0x494   :  { %v829_v12 = vadd.f32 %v821_v10, %v1425_v26 }
 0x495   :  { %832 = vst.msk [vmem:[#allocation13 + $0x8] sm:$0xff] %vm146_vm1, %v830_v11 }
 0x496   :  { %831 = vst.msk [vmem:[#allocation13] sm:$0xff] %vm146_vm1, %v829_v12 }
 0x497   :  { %1207 = shalt.err (!%p1204_p10)
}
 0x498   :  { %s1208_s24 = scalar_lea.hbm %s1534_s15, 256 }
 0x499   :  { %p1209_p11 = scmp.ne.s32.totalorder %s1534_s15, %s1208_s24  ;;  %p1212_p12 = scmp.lt.u32.totalorder %s1208_s24, %s1534_s15 }
 0x49b   :  { %p1214_p13 = pnand %p1212_p12, %p1209_p11 }
 0x49d   :  { %1217 = shalt.err (!%p1214_p13)
}
 0x49e   :  { %844 = dma.vmem_to_hbm [thread:$0]  %s839_s6, 256, %s1534_s15, [#allocation4], %s1231_s12, %s1231_s12, %s1232_s21  }
 0x49f   :  { %1226 = dma.done.wait [#allocation4], 256  }
 0x4a0   :  { %1227 = vsyncadd [#allocation4], 4294967040 }
 0x4a1   :  { %848 = vsyncpa [#allocation3], 1 }
 0x4a2   :  { %849 = vsyncpa [#allocation6], 1 }
 0x4a3   :  { %850 = vsyncpa [#allocation9], 1 }
 0x4a4   :  { %851 = vsyncpa [#allocation12], 1 }
 0x4a5   :  { %852 = vsyncpa [#allocation4], 1 }

</bundles_post_ra>
